<compile_context>
chip_gen: v7x
topology: tpu7x:2x2x1
jax: 0.10.0
libtpu: 0.0.40
codegen_flags: <defaults>
</compile_context>

<pallas_src>
import numpy as np
import jax
import jax.numpy as jnp
from jax import lax
from jax.experimental import pallas as pl
from jax.experimental.pallas import tpu as pltpu


# ---------------------------------------------------------------------------
# Parameter construction (mirrors the PyTorch get_sinusoid_encoding)
# ---------------------------------------------------------------------------
def get_sinusoid_encoding(position_size: int, hidden_size: int) -> np.ndarray:
    hidden_idx = np.arange(hidden_size)
    exponents = 2 * (hidden_idx // 2) / hidden_size                    # float64
    denom = np.power(10000.0, exponents)                               # float64
    angles = np.arange(position_size, dtype=np.float64)[:, None] / denom[None, :]
    enc = np.array(angles)
    enc[:, 0::2] = np.sin(angles[:, 0::2])
    enc[:, 1::2] = np.cos(angles[:, 1::2])
    return enc.astype("float32")


# ---------------------------------------------------------------------------
# Exact 3-way bf16 split, fused layout:  cat([hi, mid, lo], axis=1) -> (L, 3E)
# with hi + mid + lo == table bit-exactly (sum order (hi+mid)+lo).
# ---------------------------------------------------------------------------
def _exact_bf16_split_cat(table_f32: jax.Array) -> jax.Array:
    t = table_f32.astype(jnp.float32)

    def trunc_to_bf16(v):
        bits = lax.bitcast_convert_type(v, jnp.uint32)
        return lax.bitcast_convert_type(bits & jnp.uint32(0xFFFF0000), jnp.float32)

    hi = trunc_to_bf16(t)
    r1 = t - hi                       # exact
    mid = trunc_to_bf16(r1)
    lo = r1 - mid                     # exact
    # Each plane is exactly bf16-representable (mantissa-truncated), so the cast
    # below is lossless.  NOTE: exactness assumes magnitudes stay out of the bf16
    # subnormal-flush range, which holds for sinusoid tables.
    return jnp.concatenate([hi, mid, lo], axis=1).astype(jnp.bfloat16)   # (L, 3E)


# ---------------------------------------------------------------------------
# Path A kernel: one-hot MXU gather, one fused matmul per row block
# ---------------------------------------------------------------------------
def _onehot_gather_kernel(ids_ref, tbl_ref, out_ref):
    # ids_ref : VMEM (rows, 1)      int32     position ids of this row block
    # tbl_ref : VMEM (L, 3*emb)     bfloat16  resident fused hi|mid|lo split
    # out_ref : VMEM (rows, emb)    float32
    rows, emb = out_ref.shape
    length = tbl_ref.shape[0]

    ids = ids_ref[...]                                            # (rows, 1)
    col = lax.broadcasted_iota(jnp.int32, (rows, length), 1)      # (rows, L)
    onehot = (ids == col).astype(jnp.bfloat16)                    # exact 0/1, bf16

    # Single MXU pass: (rows, L) x (L, 3E) -> (rows, 3E) in f32.
    prod = jnp.dot(onehot, tbl_ref[...], preferred_element_type=jnp.float32)

    hi = prod[:, 0 * emb:1 * emb]
    mid = prod[:, 1 * emb:2 * emb]
    lo = prod[:, 2 * emb:3 * emb]
    # Ordered (hi+mid)+lo reconstructs the f32 row exactly. Out-of-range ids
    # produce an all-zero row (one-hot miss), never an OOB read.
    out_ref[...] = ((hi + mid) + lo).astype(out_ref.dtype)


# ---------------------------------------------------------------------------
# Path B kernel: scalar-prefetch DMA row gather (exact, HBM-roofline)
# ---------------------------------------------------------------------------
def _dma_gather_kernel(ids_smem_ref, row_ref, out_ref):
    del ids_smem_ref  # consumed by the index_map (data-dependent block index)
    out_ref[...] = row_ref[...]


def _gather_dma_rows(ids_flat: jax.Array, table: jax.Array) -> jax.Array:
    n = ids_flat.shape[0]
    length, emb = table.shape
    # Clamp: an OOB block index would be an out-of-bounds DMA.
    ids = jnp.clip(ids_flat, 0, length - 1).astype(jnp.int32)
    return pl.pallas_call(
        _dma_gather_kernel,
        out_shape=jax.ShapeDtypeStruct((n, emb), table.dtype),
        grid_spec=pltpu.PrefetchScalarGridSpec(
            num_scalar_prefetch=1,
            grid=(n,),
            in_specs=[pl.BlockSpec((1, emb), lambda i, ids_ref: (ids_ref[i], 0))],
            out_specs=pl.BlockSpec((1, emb), lambda i, ids_ref: (i, 0)),
        ),
        compiler_params=pltpu.CompilerParams(dimension_semantics=("arbitrary",)),
    )(ids, table)


# ---------------------------------------------------------------------------
# Sizing helpers
# ---------------------------------------------------------------------------
_ONEHOT_MAX_LENGTH = 256   # past this the one-hot FLOPs exceed the HBM-gather roofline
_MIN_ROWS = 128            # never run the MXU path with tiny row blocks
_MAX_ROWS = 2048


def _round_up(x: int, m: int) -> int:
    return (x + m - 1) // m * m


def _vmem_limits() -> tuple[int, int]:
    """(scoped vmem limit to request, sizing budget) per generation."""
    cap = 64 * 1024 * 1024            # conservative fallback (v7x per-TC VMEM)
    try:
        cap = int(pltpu.get_tpu_info().vmem_capacity_bytes)
    except Exception:
        pass
    limit = min(cap * 3 // 4, 96 * 1024 * 1024)   # v5e/v6e: 96 MiB, v7x: 48 MiB
    budget = limit * 3 // 4                        # headroom for compiler scratch
    return int(limit), int(budget)


def _choose_rows_per_block(n_rows: int, max_length: int, emb: int,
                           budget_bytes: int) -> int:
    """Row block for the one-hot path; 0 means 'use the DMA gather path'."""
    lanes = 128
    l_pad = _round_up(max_length, lanes)
    e_pad = _round_up(emb, lanes)
    e3_pad = _round_up(3 * emb, lanes)

    table_bytes = max_length * 3 * emb * 2          # single-buffered resident table
    per_row = (2 * lanes * 4                        # (rows,1) ids block, double-buffered
               + 2 * e_pad * 4                      # f32 out block, double-buffered
               + l_pad * 2                          # bf16 one-hot
               + l_pad * 4                          # int32 iota for the compare
               + e3_pad * 4                         # f32 fused matmul result
               + e_pad * 4)                         # f32 reduced accumulator

    avail = budget_bytes - table_bytes
    if avail < _MIN_ROWS * per_row:
        return 0                                    # don't collapse to tiny blocks

    rows = min(_MAX_ROWS, avail // per_row)
    rows = (rows // 8) * 8
    # Prefer >= 2 grid steps (megacore balance on v7x) and don't exceed the problem.
    two_step = _round_up(max((n_rows + 1) // 2, 8), 8)
    rows = min(rows, two_step, _round_up(n_rows, 8))
    return int(max(rows, 8))


# ---------------------------------------------------------------------------
# Wrapper: exact row gather, dispatching between one-hot MXU and DMA gather
# ---------------------------------------------------------------------------
def positional_embedding(position_ids: jax.Array, table: jax.Array,
                         table_split_cat: jax.Array | None = None) -> jax.Array:
    orig_shape = position_ids.shape
    max_length, emb = table.shape

    ids_flat = position_ids.reshape(-1).astype(jnp.int32)
    n = int(ids_flat.shape[0])

    vmem_limit, budget = _vmem_limits()

    rows = 0
    if max_length <= _ONEHOT_MAX_LENGTH:
        rows = _choose_rows_per_block(n, max_length, emb, budget)

    if rows == 0:
        # Large table (or budget miss): HBM-roofline DMA row gather, f32, exact.
        out = _gather_dma_rows(ids_flat, table)
    else:
        if table_split_cat is None:
            table_split_cat = _exact_bf16_split_cat(table)

        n_pad = _round_up(n, rows)
        if n_pad != n:
            ids_flat = jnp.pad(ids_flat, (0, n_pad - n))   # pad ids gather row 0, sliced off
        ids_2d = ids_flat.reshape(n_pad, 1)

        out = pl.pallas_call(
            _onehot_gather_kernel,
            out_shape=jax.ShapeDtypeStruct((n_pad, emb), table.dtype),
            grid=(n_pad // rows,),
            in_specs=[
                pl.BlockSpec((rows, 1), lambda i: (i, 0)),
                # Whole fused split table resident in VMEM: single copy, single buffer.
                pl.BlockSpec(memory_space=pltpu.MemorySpace.VMEM),
            ],
            out_specs=pl.BlockSpec((rows, emb), lambda i: (i, 0)),
            compiler_params=pltpu.CompilerParams(
                dimension_semantics=("parallel",),       # disjoint output tiles
                vmem_limit_bytes=vmem_limit,
            ),
        )(ids_2d, table_split_cat)

        if n_pad != n:
            out = out[:n]

    return out.reshape(*orig_shape, emb)


# ---------------------------------------------------------------------------
# Module-like wrapper
# ---------------------------------------------------------------------------
class PositionalEmbeddingPallas:
    def __init__(self, max_length: int, embedding_size: int):
        self.max_length = max_length
        self.embedding_size = embedding_size
        self.table = jnp.asarray(get_sinusoid_encoding(max_length, embedding_size))
        # Precompute the exact bf16 split once (not per forward call).
        self.table_split_cat = _exact_bf16_split_cat(self.table)

    def __call__(self, position_ids):
        # torch's detach()/requires_grad_(False) are autograd no-ops here.
        return positional_embedding(position_ids, self.table, self.table_split_cat)


if __name__ == "__main__":
    key = jax.random.PRNGKey(0)
    k0, k1 = jax.random.split(key)
    batch, seq = 2, 8

    # Case 1: small table (max_length=64) -> one-hot MXU gather path.
    max_length, embedding_size = 64, 32
    position_ids = jax.random.randint(
        k0, (batch, seq), minval=0, maxval=max_length, dtype=jnp.int32
    )
    module = PositionalEmbeddingPallas(max_length, embedding_size)
    out = jax.block_until_ready(module(position_ids))
    ref = jnp.take(module.table, position_ids, axis=0)
    assert out.shape == (batch, seq, embedding_size), out.shape
    assert out.dtype == jnp.float32, out.dtype
    np.testing.assert_allclose(np.asarray(out), np.asarray(ref), rtol=0, atol=0)

    # Case 2: larger table (max_length=384 > crossover) -> DMA row-gather path.
    big_length = 384
    position_ids_big = jax.random.randint(
        k1, (batch, seq), minval=0, maxval=big_length, dtype=jnp.int32
    )
    module_big = PositionalEmbeddingPallas(big_length, embedding_size)
    out_big = jax.block_until_ready(module_big(position_ids_big))
    ref_big = jnp.take(module_big.table, position_ids_big, axis=0)
    assert out_big.shape == (batch, seq, embedding_size), out_big.shape
    np.testing.assert_allclose(np.asarray(out_big), np.asarray(ref_big), rtol=0, atol=0)

    print("KERNEL_OK")
</pallas_src>

<mosaic_0001>
module attributes {stable_mosaic.version = 11 : i64} {
  func.func @_onehot_gather_kernel(%arg0: i32, %arg1: memref<8x1xi32, #tpu.memory_space<vmem>>, %arg2: memref<64x96xbf16, #tpu.memory_space<vmem>>, %arg3: memref<8x32xf32, #tpu.memory_space<vmem>>) attributes {dimension_semantics = [#tpu.dimension_semantics<parallel>], iteration_bounds = array<i64: 2>, scalar_prefetch = 0 : i64, scratch_operands = 0 : i64, tpu.core_type = #tpu.core_type<tc>, window_params = [{transform_indices = @transform_0, window_bounds = array<i64: 8, 1>}, {pipeline_mode = #tpu.pipeline_mode<synchronous>, transform_indices = @transform_1, window_bounds = array<i64: 64, 96>}, {transform_indices = @transform_2, window_bounds = array<i64: 8, 32>}]} {
    %c0 = arith.constant 0 : index
    %c0_0 = arith.constant 0 : index
    %0 = vector.load %arg1[%c0, %c0_0] : memref<8x1xi32, #tpu.memory_space<vmem>>, vector<8x1xi32>
    %1 = tpu.iota {dimensions = array<i32: 1>} : vector<8x64xi32>
    %2 = vector.broadcast %0 : vector<8x1xi32> to vector<8x64xi32>
    %3 = arith.cmpi eq, %2, %1 : vector<8x64xi32>
    %4 = arith.extui %3 : vector<8x64xi1> to vector<8x64xi32>
    %5 = arith.sitofp %4 : vector<8x64xi32> to vector<8x64xf32>
    %6 = arith.truncf %5 : vector<8x64xf32> to vector<8x64xbf16>
    %c0_1 = arith.constant 0 : index
    %c0_2 = arith.constant 0 : index
    %7 = vector.load %arg2[%c0_1, %c0_2] : memref<64x96xbf16, #tpu.memory_space<vmem>>, vector<64x96xbf16>
    %cst = arith.constant dense<0.000000e+00> : vector<8x96xf32>
    %8 = tpu.matmul %6, %7, %cst {dimension_numbers = #tpu.dot_dimension_numbers<[1], [0], [0], [1], [0, 0, 1, 1], [], []>} : vector<8x64xbf16>, vector<64x96xbf16>, vector<8x96xf32> -> vector<8x96xf32>
    %9 = vector.extract_strided_slice %8 {offsets = [0, 0], sizes = [8, 32], strides = [1, 1]} : vector<8x96xf32> to vector<8x32xf32>
    %10 = vector.extract_strided_slice %8 {offsets = [0, 32], sizes = [8, 32], strides = [1, 1]} : vector<8x96xf32> to vector<8x32xf32>
    %11 = vector.extract_strided_slice %8 {offsets = [0, 64], sizes = [8, 32], strides = [1, 1]} : vector<8x96xf32> to vector<8x32xf32>
    %12 = arith.addf %9, %10 : vector<8x32xf32>
    %13 = arith.addf %12, %11 : vector<8x32xf32>
    %c0_3 = arith.constant 0 : index
    %c0_4 = arith.constant 0 : index
    %14 = vector.load %arg3[%c0_3, %c0_4] : memref<8x32xf32, #tpu.memory_space<vmem>>, vector<8x32xf32>
    tpu.vector_store %arg3[%c0_3, %c0_4], %13 {strides = array<i32>} : memref<8x32xf32, #tpu.memory_space<vmem>>, vector<8x32xf32>,
    return
  }
  func.func @transform_0(%arg0: i32) -> (i32, i32) {
    %c0_i32 = arith.constant 0 : i32
    %c0_i32_0 = arith.constant 0 : i32
    return %arg0, %c0_i32 : i32, i32
  }
  func.func @transform_1(%arg0: i32) -> (i32, i32) {
    %c0_i32 = arith.constant 0 : i32
    %c0_i32_0 = arith.constant 0 : i32
    %c0_i32_1 = arith.constant 0 : i32
    return %c0_i32, %c0_i32_0 : i32, i32
  }
  func.func @transform_2(%arg0: i32) -> (i32, i32) {
    %c0_i32 = arith.constant 0 : i32
    %c0_i32_0 = arith.constant 0 : i32
    return %arg0, %c0_i32 : i32, i32
  }
}

</mosaic_0001>

<bundles_post_ra>
// kernel: tpu_custom_call.1
= control target key start
LH: loop header
LB: loop body
LE: loop exit
PB: predicated region body
PF: predicated region fallthrough
CT: control target
= control target key end

     0   :  { %7 = vsyncpa [#allocation3], 0  ;;  %s689_s0 = inlined_call_operand.vmem [shape: s32[16,1], index: 0, kind: input, shape index: {}]   ;;  %s690_s1 = inlined_call_operand.hbm [shape: bf16[64,96], index: 1, kind: input, shape index: {}]   ;;  %s691_s2 = inlined_call_operand.hbm [shape: f32[16,32], index: 2, kind: output, shape index: {}]  }
   0x1   :  { %8 = vsyncpa [#allocation4], 0 }
   0x2   :  { %10 = vsyncpa [#allocation4 + $0x1], 0  ;;  %s554_s9 = smov 0   ;;  %s556_s10 = smov 0  }
   0x3   :  { %s558_s11 = smov 0   ;;  %s560_s12 = smov 0  }
   0x4 LB: > { %s575_s13 = sadd.s32 4294967295, %s528_s12   ;;  %s337_s14 = sadd.s32 4294967294, %s528_s12   ;;  %s528_s12 = sphi %s560_s12, %s707_s12   ;;  %s524_s11 = sphi %s558_s11, %s706_s11   ;;  %s520_s10 = sphi %s556_s10, %s705_s10   ;;  %s516_s9 = sphi %s554_s9, %s704_s9  }
   0x5   : > { %s579_s15 = sadd.s32 1, %s528_s12   ;;  %s70_s16 = sadd.s32 1, %s524_s11 }
   0x6   : > { %s67_s17 = ssub.s32 %s528_s12, %s579_s15  ;;  %p80_p0 = scmp.ne.s32.totalorder %s524_s11, %s520_s10 }
   0x7   : > { %p68_p1 = scmp.eq.s32.totalorder %s67_s17, 0  ;;  %p81_p2 = scmp.eq.s32.totalorder %s575_s13, 1 }
   0x8   : > { %p86_p3 = scmp.ne.s32.totalorder %s520_s10, %s516_s9  ;;  %p87_p4 = scmp.eq.s32.totalorder %s337_s14, 1 }
   0x9   : > { %s590_s18 = scalar_select %p68_p1, %s524_s11, %s70_s16  }
   0xa   : > { %p592_p5 = por %p81_p2, %p80_p0  ;;  %p596_p6 = por %p87_p4, %p86_p3 }
   0xb   : > { %p338_p7 = scmp.ge.s32.totalorder %s528_s12, 1  ;;  %p94_p8 = scmp.lt.s32.totalorder %s528_s12, 3 }
   0xc   : > { %s695_s19 = scalar_select %p592_p5, 1, 0 }
   0xd   : > { %s696_s20 = scalar_select %p596_p6, 1, 0 }
   0xe   : > { %p692_p9 = scmp.eq.s32.totalorder %s575_s13, 0  ;;  %p603_p10 = pnand %p338_p7, %p94_p8 }
   0xf   : > { %s530_s22 = smov [#allocation2]   ;;  %s434_s27 = scalar_lea.hbm %s690_s1, 512 }
  0x10   : > { %s697_s21 = scalar_select %p603_p10, 1, 0 }
  0x11   : > { %s106_s23 = sshll.u32 %s530_s22, 4  ;;  %p378_p11 = pneg %p603_p10  ;;  %s107_s23 = int_to_ptr.vmem [resolvable:$true] %s106_s23 }
  0x12   : > { %p435_p13 = scmp.ne.s32.totalorder %s690_s1, %s434_s27  ;;  %p441_p3 = scmp.lt.u32.totalorder %s434_s27, %s690_s1 }
  0x13   : > { %p611_p12 = pnand %p692_p9, %p378_p11 }
  0x15   : > { %p436_p0 = pneg %p611_p12 }
  0x17   : > { %p437_p1 = pnand %p436_p0, %p435_p13 }
  0x19   : > { %p438_p2 = pneg %p437_p1 }
  0x1b   : > { %p443_p4 = pnand %p441_p3, %p438_p2 }
  0x1d   : > { %446 = shalt.err (!%p443_p4)
}
  0x1e   : > { %s447_s4 = scalar_lea.vmem %s107_s23, 512  ;;  %p455_p9 = scmp.lt.s32.totalorder %s107_s23, %s107_s23 }
  0x1f   : > { %p448_p7 = scmp.ne.s32.totalorder %s107_s23, %s447_s4  ;;  %p456_p6 = scmp.lt.s32.totalorder %s447_s4, %s447_s4 }
  0x21   : > { %p450_p8 = pnand %p448_p7, %p436_p0  ;;  %p457_p5 = por %p456_p6, %p455_p9 }
  0x23   : > { %p451_p11 = pneg %p450_p8 }
  0x25   : > { %p458_p10 = pnand %p457_p5, %p451_p11 }
  0x27   : > { %461 = shalt.err (!%p458_p10)
}
  0x28   : > { %s531_s5 = smov 64   ;;  %s532_s6 = smov 4  }
  0x29   : > { %381 = dma.hbm_to_vmem [thread:$0]  (!%p611_p12), %s690_s1, 512, %s107_s23, [#allocation3], %s531_s5, %s531_s5, %s532_s6  }
  0x2a   : > { %p699_p13 = scmp.ne.s32.totalorder %s697_s21, 0 }
  0x2b   : > { %p700_p1 = scmp.eq.s32.totalorder (!%p699_p13), %s575_s13, 0 }
  0x2c   : > { %129 = sbr.rel (%p699_p13) target bundleno = 536 (0x218), region = 28 }
  0x33   : > { %507 = dma.done.wait (%p700_p1), [#allocation3], 512   ;;  %p701_p0 = pmov %p700_p1 }
  0x34   : > { %p150_p5 = scmp.lt.s32.totalorder %s575_s13, 1  ;;  %v533_v0 = vmov 0   ;;  %v534_v1 = vmov 0.0   ;;  %v430_v3 = vld [vmem:[#allocation2] sm:$0xff]   ;;  %v431_v4 = vld [vmem:[#allocation2 + $0x8] sm:$0xff]   ;;  %vm535_vm0 = vmmov 0   ;;  %v156_v7 = vlaneseq }
  0x35   : > { %509 = vsyncadd (%p701_p0), [#allocation3], 4294966784  ;;  %429 = vset.pattern.permute.xlu0 %v533_v0  ;;  %360 = vmatprep.subr.bf16.mxu0 %v534_v1  ;;  %v432_v5 = vld [vmem:[#allocation2 + $0x10] sm:$0xff]   ;;  %v433_v6 = vld [vmem:[#allocation2 + $0x18] sm:$0xff]   ;;  %vm197_vm2 = vcmask 523264   ;;  %s536_s23 = smov 64  }
  0x36   : > { %s151_s14 = scalar_select %p150_p5, %s575_s13, 1  ;;  %361 = vmatpush3.bf16.msra.mxu0 %v430_v3  ;;  %368 = vmatprep.mubr.msk.bf16.mxu0 %vm535_vm0, %v534_v1  ;;  %v157_v8 = vand.u32 127, %v156_v7  ;;  %vm250_vm3 = vcmask 261120  }
  0x37   : > { %362 = vmatprep.subr.bf16.mxu0 %v534_v1  ;;  %s537_s24 = smov 96   ;;  %s147_s25 = sand.u32 1, %s520_s10  }
  0x38   : > { %s344_s16 = sshll.u32 %s151_s14, 3  ;;  %s343_s26 = sshll.u32 %s147_s25, 3 }
  0x39   : > { %s153_s21 = scalar_lea.vmem %s689_s0, %s344_s16  ;;  %s352_s27 = sshll.u32 %s575_s13, 7 }
  0x3a   : > { %v155_v2 = vld [vmem:[%s153_s21] sm:$0xff]  ;;  %363 = vmatpush3.bf16.msra.mxu0 %v431_v4  ;;  %s149_s28 = scalar_lea.vmem [#allocation5], %s343_s26  ;;  %s647_s4 = scalar_lea.hbm %s691_s2, %s352_s27 }
  0x3b   : > { %159 = vperm.xlu0 %429, %v155_v2   ;;  %364 = vmatprep.subr.bf16.mxu0 %v534_v1  ;;  %s266_s29 = sshll.u32 %s149_s28, 4  ;;  %s253_s5 = scalar_lea.sflag [#allocation4], %s147_s25  ;;  %s649_s29 = int_to_ptr.vmem [resolvable:$true] %s266_s29 }
  0x3c   : > { %s462_s6 = scalar_lea.vmem %s649_s29, 128  ;;  %p702_p9 = scmp.ne.s32.totalorder %s695_s19, 0 }
  0x3d   : > { %p463_p6 = scmp.ne.s32.totalorder %s649_s29, %s462_s6  ;;  %s538_s13 = smov [#allocation5]  }
  0x3e   : > { %365 = vmatpush3.bf16.msra.mxu0 %v432_v5  ;;  %s466_s7 = sshll.u32 %s538_s13, 4  ;;  %s467_s7 = int_to_ptr.vmem [resolvable:$false] %s466_s7 }
  0x3f   : > { %366 = vmatprep.subr.bf16.mxu0 %v534_v1  ;;  %p464_p10 = pnand %p463_p6, %p702_p9  ;;  %s468_s8 = scalar_lea.vmem %s467_s7, 256 }
  0x40   : > { %p469_p2 = scmp.lt.s32.totalorder %s649_s29, %s467_s7  ;;  %p470_p3 = scmp.lt.s32.totalorder %s468_s8, %s462_s6 }
  0x41   : > { %p465_p12 = pneg %p464_p10 }
  0x42   : > { %367 = vmatpush3.bf16.msra.mxu0 %v433_v6  ;;  %p471_p4 = por %p470_p3, %p469_p2 }
  0x44   : > { %p472_p7 = pnand %p471_p4, %p465_p12 }
  0xba   : > { %v160_v9 = vpop.permute.xlu0 %159 }
  0xbb   : > { %vm161_vm1 = vcmp.eq.s32.totalorder %v160_v9, %v157_v8 }
  0xbc   : > { %v345_v10 = vsel %vm161_vm1, 1.0, %v534_v1 }
  0xbd   : > { %v164_v11 = vpack.c.bf16 %v345_v10, %v345_v10 }
  0xbf   : > { %369 = vmatmul.mubr.msk.bf16.vlgmr.msra.gmra.mrb[0].mxu0 %vm197_vm2, %v164_v11 }
 0x192   : > { %v235_v12 = vpop.f32.mrb[0].mxu0 }
 0x193   : > { %246 = vrot.lane.b32.xlu1 %v235_v12, %s536_s23  ;;  %242 = vrot.lane.b32.xlu0 %v235_v12, %s537_s24  ;;  %v370_v13 = vpop.f32.mrb[1].mxu0 }
 0x194   : > { %v238_v14 = vpop.f32.mrb[2].mxu0 }
 0x195   : > { %v371_v15 = vpop.f32.mrb[3].mxu0 }
 0x205   : > { %v243_v16 = vpop.permute.xlu0 %242  ;;  %v247_v18 = vpop.permute.xlu1 %246 }
 0x206   : > { %v245_v17 = vadd.f32 %v243_v16, %v235_v12 }
 0x208   : > { %v249_v19 = vadd.f32 %v247_v18, %v245_v17 }
 0x20a   : > { %251 = vst.msk [vmem:[%s149_s28] sm:$0xff] %vm250_vm3, %v249_v19 }
 0x20b   : > { %475 = shalt.err (!%p472_p7)
}
 0x20c   : > { %s476_s14 = scalar_lea.hbm %s647_s4, 128  ;;  %s480_s22 = scalar_lea.hbm %s691_s2, 256 }
 0x20d   : > { %p477_p8 = scmp.ne.s32.totalorder %s647_s4, %s476_s14  ;;  %p481_p1 = scmp.lt.u32.totalorder %s647_s4, %s691_s2 }
 0x20e   : > { %p482_p0 = scmp.lt.u32.totalorder %s480_s22, %s476_s14  ;;  %p484_p6 = scmp.lt.u32.totalorder %s476_s14, %s647_s4 }
 0x20f   : > { %p478_p11 = pnand %p477_p8, %p702_p9 }
 0x210   : > { %p483_p5 = por %p482_p0, %p481_p1 }
 0x211   : > { %p479_p13 = pneg %p478_p11 }
 0x212   : > { %p485_p10 = por %p484_p6, %p483_p5 }
 0x214   : > { %p486_p12 = pnand %p485_p10, %p479_p13 }
 0x216   : > { %489 = shalt.err (!%p486_p12)
}
 0x217   : > { %376 = dma.vmem_to_hbm [thread:$0]  (%p702_p9), %s649_s29, 128, %s647_s4, %s253_s5  }
 0x218 PF: > { %p388_p2 = scmp.ge.s32.totalorder %s528_s12, 2  ;;  %s278_s24 = sand.u32 1, %s516_s9  }
 0x219   : > { %p703_p3 = scmp.ne.s32.totalorder %s696_s20, 0  ;;  %s279_s25 = scalar_lea.sflag [#allocation4], %s278_s24 }
 0x21b   : > { %p383_p4 = pnand %p388_p2, %p703_p3 }
 0x21d   : > { %511 = dma.done.wait (!%p383_p4), %s279_s25, 128  }
 0x21e   : > { %513 = vsyncadd (!%p383_p4), %s279_s25, 4294967168  ;;  %p13_p7 = scmp.ge.s32.totalorder %s579_s15, 4   ;;  %s704_s9 = smov %s520_s10 }
 0x21f   : > { %s705_s10 = smov %s524_s11  ;;  %s706_s11 = smov %s590_s18 }
 0x220   : > { %s707_s12 = smov %s579_s15  ;;  %15 = sbr.rel (!%p13_p7) target bundleno = 4 (0x4), region = 68 }
 0x227   :  { %284 = vsyncpa [#allocation3], 1 }
 0x228   :  { %286 = vsyncpa [#allocation3 + $0x1], 1 }
 0x229   :  { %287 = vsyncpa [#allocation4], 1 }
 0x22a   :  { %289 = vsyncpa [#allocation4 + $0x1], 1 }

</bundles_post_ra>
